<compile_context>
chip_gen: v7x
topology: tpu7x:2x2x1
jax: 0.10.0
libtpu: 0.0.40
codegen_flags: <defaults>
</compile_context>

<pallas_src>
import functools

import jax
import jax.numpy as jnp
import numpy as np
from jax.experimental import pallas as pl
from jax.experimental.pallas import tpu as pltpu

NGRAM = 3          # must be odd and satisfy (ngram - 1) < output_dim
_LANE = 128
_SUBLANE = 8


def _round_up(x, m):
    return ((x + m - 1) // m) * m


def leam_kernel(v_ref, nct_ref, convw_ref, convb_ref, fcw_ref, fcb_ref,
                z_ref, gpad_ref, *, l_real, ngram):
    """One grid step: TB batch rows of v -> TB rows of logits."""
    tb, s, e_pad = v_ref.shape
    l_pad = z_ref.shape[1]
    p = (ngram - 1) // 2

    # ---- cosine-normalize the word embeddings (rsqrt on the EUP) -----------
    v = v_ref[...]                                               # [TB,S,Ep] f32
    sumsq = jnp.sum(v * v, axis=-1, keepdims=True)               # [TB,S,1]
    inv_norm = jnp.where(sumsq > 0.0, jax.lax.rsqrt(sumsq), 0.0)  # 0-norm -> 0
    nv = (v * inv_norm).astype(jnp.bfloat16)                     # bf16 MXU feed

    # ---- single tall MXU contraction --------------------------------------
    # No batch dims here: (TB, S) together form the M dimension, i.e. one
    # flattened [TB*S, Ep] @ [Ep, Lp] bf16 matmul with f32 accumulation.
    # nct_ref already holds normalize(c)^T shifted right by p columns (the
    # Conv2d width padding, hoisted into the wrapper), so the result is the
    # width-padded similarity map `gw` directly.
    gw = jnp.einsum("bse,el->bsl", nv, nct_ref[...],
                    preferred_element_type=jnp.float32)          # [TB,S,Lp] f32

    # ---- Conv2d(1,1,(ngram,1)) along S via a zero-padded VMEM scratch ------
    # Rows [0,p) and [p+S, S+2p) stay zero ("same" row padding); tap k is then
    # a static sublane-offset slice load.  This replaces the old concatenate
    # shifts (no full-size zeros temporaries, no wrap-around masking needed).
    if p > 0:
        zrow = jnp.zeros((tb, p, l_pad), jnp.float32)
        gpad_ref[:, :p, :] = zrow
        gpad_ref[:, p + s:, :] = zrow
    gpad_ref[:, p:p + s, :] = gw

    acc = convw_ref[0] * gpad_ref[:, 0:s, :]
    for k in range(1, ngram):                                    # tiny static loop
        acc = acc + convw_ref[k] * gpad_ref[:, k:k + s, :]
    u = jnp.maximum(acc + convb_ref[0], 0.0)                     # bias once + ReLU

    # ---- MaxPool2d((1, L)): max over the first l_real lanes ----------------
    # u >= 0 after the ReLU, so masking the padded lanes with 0 is exact.
    lane = jax.lax.broadcasted_iota(jnp.int32, (tb, s, l_pad), 2)
    m = jnp.max(jnp.where(lane < l_real, u, 0.0), axis=-1, keepdims=True)  # [TB,S,1]

    # ---- softmax over the sequence dim (EUP exp + approx reciprocal) -------
    m = m - jnp.max(m, axis=1, keepdims=True)
    ex = jnp.exp(m)
    b_soft = ex * pl.reciprocal(jnp.sum(ex, axis=1, keepdims=True), approx=True)

    # ---- attention-weighted embedding + fc head (f32, lane-dense output) ---
    weighted = jnp.sum(b_soft * v, axis=1)                       # [TB,Ep]
    z = jnp.dot(weighted, fcw_ref[...],
                preferred_element_type=jnp.float32) + fcb_ref[...]
    z_ref[...] = z


def _pick_tb(s, e_pad, l_pad, budget_bytes=16 * 1024 * 1024):
    """Largest batch tile (multiple of 8) whose working set fits the budget
    (conservative: ~half of the explicit 32 MiB VMEM limit, safe on v7x)."""
    # f32 working set per batch row: double-buffered v block + normalized copy
    # + conv scratch + ~3 tap/accumulator temporaries.
    per_row = (3 * s * e_pad + 5 * s * l_pad) * 4
    tb = (budget_bytes // per_row) // _SUBLANE * _SUBLANE
    return int(min(max(tb, _SUBLANE), 1024))


def leam_forward(v, c, conv_w, conv_b, fc_w, fc_b, *, ngram=NGRAM, tb=None):
    """LEAM forward.  v:[B,S,E] f32 embeddings, c:[L,E] label embeds,
    conv_w:[ngram], conv_b:[1], fc_w:[L,E] (torch nn.Linear layout), fc_b:[L].
    Returns logits [B, L]."""
    B, S, E = v.shape
    L = c.shape[0]
    assert ngram % 2 == 1, "n-gram must be odd"
    p = (ngram - 1) // 2
    # MaxPool2d((1, L)) must yield a single column -> requires 2p < L.
    assert ngram - 1 < L, "requires ngram - 1 < output_dim"

    e_pad = _round_up(E, _LANE)
    l_pad = _round_up(L, _LANE)

    # --- weight-only preprocessing, hoisted out of the kernel ---------------
    cnorm = jnp.sqrt(jnp.sum(c * c, axis=1, keepdims=True))
    nc = jnp.where(cnorm > 0.0, c / cnorm, 0.0)                  # [L,E]
    # normalize(c)^T, zero-padded to [Ep,Lp] and shifted right by p columns:
    # the shift realizes the Conv2d width padding, so the in-kernel matmul
    # emits the width-padded similarity map directly.  bf16 feed for the MXU.
    nc_t = jnp.zeros((e_pad, l_pad), jnp.float32)
    nc_t = nc_t.at[:E, p:p + L].set(nc.T).astype(jnp.bfloat16)

    fc_w_t = jnp.zeros((e_pad, l_pad), jnp.float32).at[:E, :L].set(fc_w.T)
    fc_b_p = jnp.zeros((1, l_pad), jnp.float32).at[0, :L].set(fc_b)

    # --- batch tiling (multiple of 8 keeps every block (8,128)-tileable) ----
    if tb is None:
        tb = _pick_tb(S, e_pad, l_pad)
    tb = max(_SUBLANE, (int(tb) // _SUBLANE) * _SUBLANE)
    b_pad = _round_up(max(B, tb), tb)

    v_p = jnp.zeros((b_pad, S, e_pad), jnp.float32).at[:B, :, :E].set(v)

    # NOTE: for very long S, a second "arbitrary" grid axis with an online
    # softmax would cap VMEM at a fixed S tile; unnecessary at these shapes.
    grid = (b_pad // tb,)
    kernel = functools.partial(leam_kernel, l_real=L, ngram=ngram)
    flops = 2 * b_pad * S * e_pad * l_pad + 2 * b_pad * e_pad * l_pad
    bytes_accessed = (v_p.size + b_pad * l_pad + fc_w_t.size) * 4 + nc_t.size * 2

    z_pad = pl.pallas_call(
        kernel,
        out_shape=jax.ShapeDtypeStruct((b_pad, l_pad), jnp.float32),
        grid=grid,
        in_specs=[
            pl.BlockSpec((tb, S, e_pad), lambda i: (i, 0, 0)),        # v (streamed)
            pl.BlockSpec((e_pad, l_pad), lambda i: (0, 0)),           # shifted nc^T
            pl.BlockSpec(memory_space=pltpu.MemorySpace.SMEM),        # conv weight
            pl.BlockSpec(memory_space=pltpu.MemorySpace.SMEM),        # conv bias
            pl.BlockSpec((e_pad, l_pad), lambda i: (0, 0)),           # fc W^T
            pl.BlockSpec((1, l_pad), lambda i: (0, 0)),               # fc bias
        ],
        out_specs=pl.BlockSpec((tb, l_pad), lambda i: (i, 0)),
        scratch_shapes=[pltpu.VMEM((tb, S + 2 * p, l_pad), jnp.float32)],
        compiler_params=pltpu.CompilerParams(
            dimension_semantics=("parallel",),
            vmem_limit_bytes=32 * 1024 * 1024),
        cost_estimate=pl.CostEstimate(
            flops=flops, transcendentals=2 * b_pad * S,
            bytes_accessed=bytes_accessed),
    )(v_p, nc_t, conv_w, conv_b, fc_w_t, fc_b_p)
    return z_pad[:B, :L]


def ref_forward(v, c, conv_w, conv_b, fc_w, fc_b, ngram=NGRAM):
    """Independent pure-JAX reference mirroring the PyTorch LEAM forward
    (eval mode: dropouts are identity).  The only deliberate deviation is
    feeding the cosine-sim matmul in bfloat16 (f32 accumulation) to mirror
    the kernel's MXU dtype choice."""
    B, S, E = v.shape
    L = c.shape[0]
    p = (ngram - 1) // 2

    # batch_cosinesim: normalize, 0/0 -> NaN -> 0, g = nv @ nc^T
    nv = v / jnp.sqrt(jnp.sum(v * v, axis=2, keepdims=True))
    nv = jnp.nan_to_num(nv, nan=0.0)
    nc = c / jnp.sqrt(jnp.sum(c * c, axis=1, keepdims=True))
    nc = jnp.nan_to_num(nc, nan=0.0)
    g = jnp.matmul(nv.astype(jnp.bfloat16), nc.T.astype(jnp.bfloat16),
                   preferred_element_type=jnp.float32)            # [B,S,L]

    # Conv2d(1, 1, (ngram, 1), padding=(p, p) on BOTH spatial dims) + ReLU.
    u = jax.lax.conv_general_dilated(
        g[:, None], conv_w.reshape(1, 1, ngram, 1), (1, 1),
        padding=((p, p), (p, p)),
        dimension_numbers=("NCHW", "OIHW", "NCHW"))[:, 0]
    u = jnp.maximum(u + conv_b[0], 0.0)                           # [B,S,L+2p]

    # MaxPool2d((1, L)) (stride defaults to kernel size): a single column =
    # the max over the first L width-padded conv columns.
    m = jnp.max(u[:, :, :L], axis=-1)                             # [B,S]
    b_soft = jax.nn.softmax(m, axis=1)                            # [B,S]

    weighted = jnp.sum(b_soft[:, :, None] * v, axis=1)            # [B,E]
    return weighted @ fc_w.T + fc_b                               # [B,L]


if __name__ == "__main__":
    # Small shapes consistent with the module's forward.
    B, S, E, L = 12, 8, 32, 8          # batch, seq, embedding_dim, output_dim
    vocab, pad_idx = 50, 0

    key = jax.random.PRNGKey(0)
    k_emb, k_c, k_cw, k_cb, k_fw, k_fb, k_txt = jax.random.split(key, 7)

    # nn.Embedding(vocab, E, padding_idx=pad_idx): zero the pad row.
    emb_table = jax.random.normal(k_emb, (vocab, E), jnp.float32)
    emb_table = emb_table.at[pad_idx].set(0.0)

    # self.c = torch.rand((output_dim, embedding_dim)) -> uniform [0, 1)
    c = jax.random.uniform(k_c, (L, E), jnp.float32)

    # Conv2d(1, 1, (ngram, 1)): weight [1,1,ngram,1] squeezed to [ngram], bias [1]
    conv_w = jax.random.normal(k_cw, (NGRAM,), jnp.float32) * 0.5
    conv_b = jax.random.normal(k_cb, (1,), jnp.float32) * 0.1

    # nn.Linear(E, L): weight [L, E] (torch layout), bias [L]
    fc_w = jax.random.normal(k_fw, (L, E), jnp.float32) * 0.1
    fc_b = jax.random.normal(k_fb, (L,), jnp.float32) * 0.1

    # Token ids; include a padding token to exercise the NaN->0 cosine path.
    text = jax.random.randint(k_txt, (B, S), 0, vocab, jnp.int32)
    text = text.at[0, 0].set(pad_idx)

    # Embedding lookup (plain-JAX glue gather).
    v = emb_table[text]                                           # [B,S,E]

    # tb=8 -> B is padded 12 -> 16 and grid=(2,), so the multi-step,
    # batch-padded pipeline path is actually exercised at these toy shapes.
    z = leam_forward(v, c, conv_w, conv_b, fc_w, fc_b, tb=8)
    z = jax.block_until_ready(z)

    z_ref = ref_forward(v, c, conv_w, conv_b, fc_w, fc_b)
    # Loose-ish tolerance covers the deliberate bf16 MXU feed and the
    # approx-reciprocal softmax denominator (both << 2e-2).
    np.testing.assert_allclose(np.asarray(z), np.asarray(z_ref),
                               rtol=2e-2, atol=2e-2)
    print("KERNEL_OK")
</pallas_src>

<mosaic_0001>
module attributes {stable_mosaic.version = 11 : i64} {
  func.func @leam_kernel(%arg0: i32, %arg1: memref<8x8x128xf32, #tpu.memory_space<vmem>>, %arg2: memref<128x128xbf16, #tpu.memory_space<vmem>>, %arg3: memref<3xf32, #tpu.memory_space<smem>>, %arg4: memref<1xf32, #tpu.memory_space<smem>>, %arg5: memref<128x128xf32, #tpu.memory_space<vmem>>, %arg6: memref<1x128xf32, #tpu.memory_space<vmem>>, %arg7: memref<8x128xf32, #tpu.memory_space<vmem>>, %arg8: memref<8x10x128xf32, #tpu.memory_space<vmem>>) attributes {dimension_semantics = [#tpu.dimension_semantics<parallel>], iteration_bounds = array<i64: 2>, scalar_prefetch = 0 : i64, scratch_operands = 1 : i64, tpu.core_type = #tpu.core_type<tc>, window_params = [{transform_indices = @transform_0, window_bounds = array<i64: 8, 8, 128>}, {pipeline_mode = #tpu.pipeline_mode<synchronous>, transform_indices = @transform_1, window_bounds = array<i64: 128, 128>}, {transform_indices = @transform_2, window_bounds = array<i64: 3>}, {transform_indices = @transform_3, window_bounds = array<i64: 1>}, {pipeline_mode = #tpu.pipeline_mode<synchronous>, transform_indices = @transform_4, window_bounds = array<i64: 128, 128>}, {pipeline_mode = #tpu.pipeline_mode<synchronous>, transform_indices = @transform_5, window_bounds = array<i64: 1, 128>}, {transform_indices = @transform_6, window_bounds = array<i64: 8, 128>}]} {
    %c0 = arith.constant 0 : index
    %c0_0 = arith.constant 0 : index
    %c0_1 = arith.constant 0 : index
    %0 = vector.load %arg1[%c0, %c0_0, %c0_1] : memref<8x8x128xf32, #tpu.memory_space<vmem>>, vector<8x8x128xf32>
    %1 = arith.mulf %0, %0 : vector<8x8x128xf32>
    %cst = arith.constant dense<0.000000e+00> : vector<8x8xf32>
    %2 = vector.multi_reduction <add>, %1, %cst [2] : vector<8x8x128xf32> to vector<8x8xf32>
    %3 = vector.shape_cast %2 : vector<8x8xf32> to vector<8x8x1xf32>
    %cst_2 = arith.constant 0.000000e+00 : f32
    %4 = vector.broadcast %cst_2 : f32 to vector<8x8x1xf32>
    %5 = arith.cmpf ogt, %3, %4 : vector<8x8x1xf32>
    %6 = math.rsqrt %3 : vector<8x8x1xf32>
    %cst_3 = arith.constant 0.000000e+00 : f32
    %7 = vector.broadcast %cst_3 : f32 to vector<8x8x1xf32>
    %8 = arith.select %5, %6, %7 : vector<8x8x1xi1>, vector<8x8x1xf32>
    %9 = vector.broadcast %8 : vector<8x8x1xf32> to vector<8x8x128xf32>
    %10 = arith.mulf %0, %9 : vector<8x8x128xf32>
    %11 = arith.truncf %10 : vector<8x8x128xf32> to vector<8x8x128xbf16>
    %c0_4 = arith.constant 0 : index
    %c0_5 = arith.constant 0 : index
    %12 = vector.load %arg2[%c0_4, %c0_5] : memref<128x128xbf16, #tpu.memory_space<vmem>>, vector<128x128xbf16>
    "tpu.trace_start"() <{level = 10 : i32, message = "bse,el->bsl"}> : () -> ()
    %cst_6 = arith.constant dense<0.000000e+00> : vector<8x8x128xf32>
    %13 = tpu.matmul %11, %12, %cst_6 {dimension_numbers = #tpu.dot_dimension_numbers<[2], [0], [0, 1], [1], [0, 0, 0, 1, 1, 1], [], []>} : vector<8x8x128xbf16>, vector<128x128xbf16>, vector<8x8x128xf32> -> vector<8x8x128xf32>
    %cst_7 = arith.constant 0.000000e+00 : f32
    "tpu.trace_stop"() : () -> ()
    %14 = vector.broadcast %cst_7 : f32 to vector<8x1x128xf32>
    %c0_8 = arith.constant 0 : index
    %c0_9 = arith.constant 0 : index
    %c0_10 = arith.constant 0 : index
    %15 = vector.load %arg8[%c0_8, %c0_9, %c0_10] : memref<8x10x128xf32, #tpu.memory_space<vmem>>, vector<8x1x128xf32>
    tpu.vector_store %arg8[%c0_8, %c0_9, %c0_10], %14 {strides = array<i32>} : memref<8x10x128xf32, #tpu.memory_space<vmem>>, vector<8x1x128xf32>,
    %c0_11 = arith.constant 0 : index
    %c9 = arith.constant 9 : index
    %c0_12 = arith.constant 0 : index
    %16 = vector.load %arg8[%c0_11, %c9, %c0_12] : memref<8x10x128xf32, #tpu.memory_space<vmem>>, vector<8x1x128xf32>
    tpu.vector_store %arg8[%c0_11, %c9, %c0_12], %14 {strides = array<i32>} : memref<8x10x128xf32, #tpu.memory_space<vmem>>, vector<8x1x128xf32>,
    %c0_13 = arith.constant 0 : index
    %c1 = arith.constant 1 : index
    %c0_14 = arith.constant 0 : index
    %17 = vector.load %arg8[%c0_13, %c1, %c0_14] : memref<8x10x128xf32, #tpu.memory_space<vmem>>, vector<8x8x128xf32>
    tpu.vector_store %arg8[%c0_13, %c1, %c0_14], %13 {strides = array<i32>} : memref<8x10x128xf32, #tpu.memory_space<vmem>>, vector<8x8x128xf32>,
    %c0_15 = arith.constant 0 : index
    %18 = memref.load %arg3[%c0_15] : memref<3xf32, #tpu.memory_space<smem>>
    %c0_16 = arith.constant 0 : index
    %c0_17 = arith.constant 0 : index
    %c0_18 = arith.constant 0 : index
    %19 = vector.load %arg8[%c0_16, %c0_17, %c0_18] : memref<8x10x128xf32, #tpu.memory_space<vmem>>, vector<8x8x128xf32>
    %20 = vector.broadcast %18 : f32 to vector<8x8x128xf32>
    %21 = arith.mulf %20, %19 : vector<8x8x128xf32>
    %c1_19 = arith.constant 1 : index
    %22 = memref.load %arg3[%c1_19] : memref<3xf32, #tpu.memory_space<smem>>
    %c0_20 = arith.constant 0 : index
    %c1_21 = arith.constant 1 : index
    %c0_22 = arith.constant 0 : index
    %23 = vector.load %arg8[%c0_20, %c1_21, %c0_22] : memref<8x10x128xf32, #tpu.memory_space<vmem>>, vector<8x8x128xf32>
    %24 = vector.broadcast %22 : f32 to vector<8x8x128xf32>
    %25 = arith.mulf %24, %23 : vector<8x8x128xf32>
    %26 = arith.addf %21, %25 : vector<8x8x128xf32>
    %c2 = arith.constant 2 : index
    %27 = memref.load %arg3[%c2] : memref<3xf32, #tpu.memory_space<smem>>
    %c0_23 = arith.constant 0 : index
    %c2_24 = arith.constant 2 : index
    %c0_25 = arith.constant 0 : index
    %28 = vector.load %arg8[%c0_23, %c2_24, %c0_25] : memref<8x10x128xf32, #tpu.memory_space<vmem>>, vector<8x8x128xf32>
    %29 = vector.broadcast %27 : f32 to vector<8x8x128xf32>
    %30 = arith.mulf %29, %28 : vector<8x8x128xf32>
    %31 = arith.addf %26, %30 : vector<8x8x128xf32>
    %c0_26 = arith.constant 0 : index
    %32 = memref.load %arg4[%c0_26] : memref<1xf32, #tpu.memory_space<smem>>
    %33 = vector.broadcast %32 : f32 to vector<8x8x128xf32>
    %34 = arith.addf %31, %33 : vector<8x8x128xf32>
    %cst_27 = arith.constant 0.000000e+00 : f32
    %35 = vector.broadcast %cst_27 : f32 to vector<8x8x128xf32>
    %36 = arith.maximumf %34, %35 : vector<8x8x128xf32>
    %37 = tpu.iota {dimensions = array<i32: 2>} : vector<8x8x128xi32>
    %c8_i32 = arith.constant 8 : i32
    %38 = vector.broadcast %c8_i32 : i32 to vector<8x8x128xi32>
    %39 = arith.cmpi slt, %37, %38 : vector<8x8x128xi32>
    %cst_28 = arith.constant 0.000000e+00 : f32
    %40 = vector.broadcast %cst_28 : f32 to vector<8x8x128xf32>
    %41 = arith.select %39, %36, %40 : vector<8x8x128xi1>, vector<8x8x128xf32>
    %cst_29 = arith.constant dense<0xFF800000> : vector<8x8xf32>
    %42 = vector.multi_reduction <maximumf>, %41, %cst_29 [2] : vector<8x8x128xf32> to vector<8x8xf32>
    %43 = vector.shape_cast %42 : vector<8x8xf32> to vector<8x8x1xf32>
    %cst_30 = arith.constant dense<0xFF800000> : vector<8x1xf32>
    %44 = vector.multi_reduction <maximumf>, %43, %cst_30 [1] : vector<8x8x1xf32> to vector<8x1xf32>
    %45 = vector.shape_cast %44 : vector<8x1xf32> to vector<8x1x1xf32>
    %46 = vector.broadcast %45 : vector<8x1x1xf32> to vector<8x8x1xf32>
    %47 = arith.subf %43, %46 : vector<8x8x1xf32>
    %48 = math.exp %47 : vector<8x8x1xf32>
    %cst_31 = arith.constant dense<0.000000e+00> : vector<8x1xf32>
    %49 = vector.multi_reduction <add>, %48, %cst_31 [1] : vector<8x8x1xf32> to vector<8x1xf32>
    %50 = vector.shape_cast %49 : vector<8x1xf32> to vector<8x1x1xf32>
    %51 = tpu.reciprocal %50 {approx = true} : vector<8x1x1xf32> -> vector<8x1x1xf32>
    %52 = vector.broadcast %51 : vector<8x1x1xf32> to vector<8x8x1xf32>
    %53 = arith.mulf %48, %52 : vector<8x8x1xf32>
    %54 = vector.broadcast %53 : vector<8x8x1xf32> to vector<8x8x128xf32>
    %55 = arith.mulf %54, %0 : vector<8x8x128xf32>
    %cst_32 = arith.constant dense<0.000000e+00> : vector<8x128xf32>
    %56 = vector.multi_reduction <add>, %55, %cst_32 [1] : vector<8x8x128xf32> to vector<8x128xf32>
    %c0_33 = arith.constant 0 : index
    %c0_34 = arith.constant 0 : index
    %57 = vector.load %arg5[%c0_33, %c0_34] : memref<128x128xf32, #tpu.memory_space<vmem>>, vector<128x128xf32>
    %cst_35 = arith.constant dense<0.000000e+00> : vector<8x128xf32>
    %58 = tpu.matmul %56, %57, %cst_35 {dimension_numbers = #tpu.dot_dimension_numbers<[1], [0], [0], [1], [0, 0, 1, 1], [], []>} : vector<8x128xf32>, vector<128x128xf32>, vector<8x128xf32> -> vector<8x128xf32>
    %c0_36 = arith.constant 0 : index
    %c0_37 = arith.constant 0 : index
    %59 = vector.load %arg6[%c0_36, %c0_37] : memref<1x128xf32, #tpu.memory_space<vmem>>, vector<1x128xf32>
    %60 = vector.broadcast %59 : vector<1x128xf32> to vector<8x128xf32>
    %61 = arith.addf %58, %60 : vector<8x128xf32>
    %c0_38 = arith.constant 0 : index
    %c0_39 = arith.constant 0 : index
    %62 = vector.load %arg7[%c0_38, %c0_39] : memref<8x128xf32, #tpu.memory_space<vmem>>, vector<8x128xf32>
    tpu.vector_store %arg7[%c0_38, %c0_39], %61 {strides = array<i32>} : memref<8x128xf32, #tpu.memory_space<vmem>>, vector<8x128xf32>,
    return
  }
  func.func @transform_0(%arg0: i32) -> (i32, i32, i32) {
    %c0_i32 = arith.constant 0 : i32
    %c0_i32_0 = arith.constant 0 : i32
    %c0_i32_1 = arith.constant 0 : i32
    return %arg0, %c0_i32, %c0_i32_0 : i32, i32, i32
  }
  func.func @transform_1(%arg0: i32) -> (i32, i32) {
    %c0_i32 = arith.constant 0 : i32
    %c0_i32_0 = arith.constant 0 : i32
    %c0_i32_1 = arith.constant 0 : i32
    return %c0_i32, %c0_i32_0 : i32, i32
  }
  func.func @transform_2(%arg0: i32) -> i32 {
    %c0_i32 = arith.constant 0 : i32
    %c0_i32_0 = arith.constant 0 : i32
    return %c0_i32 : i32
  }
  func.func @transform_3(%arg0: i32) -> i32 {
    %c0_i32 = arith.constant 0 : i32
    %c0_i32_0 = arith.constant 0 : i32
    return %c0_i32 : i32
  }
  func.func @transform_4(%arg0: i32) -> (i32, i32) {
    %c0_i32 = arith.constant 0 : i32
    %c0_i32_0 = arith.constant 0 : i32
    %c0_i32_1 = arith.constant 0 : i32
    return %c0_i32, %c0_i32_0 : i32, i32
  }
  func.func @transform_5(%arg0: i32) -> (i32, i32) {
    %c0_i32 = arith.constant 0 : i32
    %c0_i32_0 = arith.constant 0 : i32
    %c0_i32_1 = arith.constant 0 : i32
    return %c0_i32, %c0_i32_0 : i32, i32
  }
  func.func @transform_6(%arg0: i32) -> (i32, i32) {
    %c0_i32 = arith.constant 0 : i32
    %c0_i32_0 = arith.constant 0 : i32
    return %arg0, %c0_i32 : i32, i32
  }
}

</mosaic_0001>

<bundles_post_ra>
// kernel: tpu_custom_call.1
= control target key start
LH: loop header
LB: loop body
LE: loop exit
PB: predicated region body
PF: predicated region fallthrough
CT: control target
= control target key end

     0   :  { %s2051_s0 = inlined_call_operand.hbm [shape: f32[16,8,128], index: 0, kind: input, shape index: {}]   ;;  %s2052_s1 = inlined_call_operand.hbm [shape: bf16[128,128], index: 1, kind: input, shape index: {}]   ;;  %s2053_s2 = inlined_call_operand.vmem [shape: f32[3], index: 2, kind: input, shape index: {}]   ;;  %s2054_s3 = inlined_call_operand.<no memory space> [shape: f32[1], index: 3, kind: input, shape index: {}]   ;;  %s2055_s4 = inlined_call_operand.hbm [shape: f32[128,128], index: 4, kind: input, shape index: {}]   ;;  %s2056_s5 = inlined_call_operand.vmem [shape: f32[1,128], index: 5, kind: input, shape index: {}]   ;;  %s2057_s6 = inlined_call_operand.hbm [shape: f32[16,128], index: 6, kind: output, shape index: {}]  }
   0x1   :  { %11 = sst [smem:[#allocation3]] %s2054_s3 }
   0x2   :  { %12 = vsyncpa [#allocation5], 0 }
   0x3   :  { %14 = vsyncpa [#allocation5 + $0x1], 0 }
   0x4   :  { %15 = vsyncpa [#allocation9], 0 }
   0x5   :  { %16 = vsyncpa [#allocation7], 0 }
   0x6   :  { %17 = vsyncpa [#allocation6], 0 }
   0x7   :  { %19 = vsyncpa [#allocation6 + $0x1], 0  ;;  %s1626_s23 = smov 0   ;;  %s1628_s24 = smov 0  }
   0x8   :  { %s1630_s25 = smov 0   ;;  %s1632_s26 = smov 0  }
   0x9 LB: > { %s1647_s3 = sadd.s32 4294967295, %s1574_s26   ;;  %s1104_s27 = sadd.s32 4294967294, %s1574_s26   ;;  %s1574_s26 = sphi %s1632_s26, %s2082_s26   ;;  %s1570_s25 = sphi %s1630_s25, %s2081_s25   ;;  %s1566_s24 = sphi %s1628_s24, %s2080_s24   ;;  %s1562_s23 = sphi %s1626_s23, %s2079_s23  }
   0xa   : > { %p45_p0 = scmp.ne.s32.totalorder %s1566_s24, %s1562_s23  ;;  %p2058_p1 = scmp.eq.s32.totalorder %s1647_s3, 0 }
   0xb   : > { %p180_p3 = scmp.eq.s32.totalorder %s1104_s27, 1  ;;  %p1105_p5 = scmp.ge.s32.totalorder %s1574_s26, 1 }
   0xc   : > { %p1656_p4 = por %p2058_p1, %p45_p0  ;;  %p187_p7 = scmp.lt.s32.totalorder %s1574_s26, 3 }
   0xd   : > { %p1661_p6 = por %p180_p3, %p45_p0  ;;  %s1576_s7 = smov [#allocation8]  }
   0xe   : > { %s2061_s28 = scalar_select %p1656_p4, 1, 0 }
   0xf   : > { %s2062_s29 = scalar_select %p1661_p6, 1, 0 }
  0x10   : > { %p1666_p8 = pnand %p1105_p5, %p187_p7  ;;  %s199_s8 = sshll.u32 %s1576_s7, 4  ;;  %s1670_s8 = int_to_ptr.vmem [resolvable:$true] %s199_s8 }
  0x11   : > { %s213_s11 = sshll.u32 %s2053_s2, 4  ;;  %s1577_s13 = smov [#allocation11]   ;;  %s1684_s11 = int_to_ptr.vmem [resolvable:$true] %s213_s11 }
  0x12   : > { %s2063_s30 = scalar_select %p1666_p8, 1, 0 }
  0x13   : > { %p1271_p9 = pneg %p1666_p8  ;;  %s1686_s14 = sshll.u32 %s1577_s13, 4  ;;  %s227_s14 = int_to_ptr.vmem [resolvable:$true] %s1686_s14 }
  0x14   : > { %s1395_s17 = scalar_lea.hbm %s2052_s1, 1024 }
  0x15   : > { %p1680_p11 = pnand %p1271_p9, %p2058_p1  ;;  %p1396_p12 = scmp.ne.s32.totalorder %s2052_s1, %s1395_s17 }
  0x16   : > { %p1402_p5 = scmp.lt.u32.totalorder %s1395_s17, %s2052_s1 }
  0x17   : > { %p1696_p13 = pneg %p1680_p11 }
  0x19   : > { %p1398_p0 = pnand %p1696_p13, %p1396_p12 }
  0x1b   : > { %p1399_p3 = pneg %p1398_p0 }
  0x1d   : > { %p1404_p7 = pnand %p1402_p5, %p1399_p3 }
  0x1f   : > { %1407 = shalt.err (!%p1404_p7)
}
  0x20   : > { %s1408_s27 = scalar_lea.vmem %s1670_s8, 1024  ;;  %p1416_p2 = scmp.lt.s32.totalorder %s1670_s8, %s1670_s8 }
  0x21   : > { %p1409_p9 = scmp.ne.s32.totalorder %s1670_s8, %s1408_s27  ;;  %p1417_p6 = scmp.lt.s32.totalorder %s1408_s27, %s1408_s27 }
  0x23   : > { %p1411_p10 = pnand %p1409_p9, %p1696_p13  ;;  %p1418_p12 = por %p1417_p6, %p1416_p2 }
  0x25   : > { %p1412_p1 = pneg %p1411_p10 }
  0x27   : > { %p1419_p0 = pnand %p1418_p12, %p1412_p1 }
  0x29   : > { %1422 = shalt.err (!%p1419_p0)
}
  0x2a   : > { %s1578_s7 = smov 64   ;;  %s1579_s9 = smov 4  }
  0x2b   : > { %1274 = dma.hbm_to_vmem [thread:$0]  (!%p1680_p11), %s2052_s1, 1024, %s1670_s8, [#allocation9], %s1578_s7, %s1578_s7, %s1579_s9  }
  0x2c   : > { %s1423_s15 = scalar_lea.vmem %s1684_s11, 16  ;;  %p1431_p1 = scmp.lt.s32.totalorder %s1684_s11, %s1684_s11 }
  0x2d   : > { %p1424_p10 = scmp.ne.s32.totalorder %s1684_s11, %s1423_s15  ;;  %p1432_p6 = scmp.lt.s32.totalorder %s1423_s15, %s1423_s15 }
  0x2f   : > { %p1426_p3 = pnand %p1424_p10, %p1696_p13  ;;  %p1433_p5 = por %p1432_p6, %p1431_p1 }
  0x31   : > { %p1427_p2 = pneg %p1426_p3 }
  0x33   : > { %p1434_p7 = pnand %p1433_p5, %p1427_p2 }
  0x35   : > { %1437 = shalt.err (!%p1434_p7)
}
  0x36   : > { %s1580_s16 = smov [#allocation10]   ;;  %s1438_s18 = scalar_lea.hbm %s2055_s4, 2048 }
  0x37   : > { %1277 = dma.vmem_to_smem (!%p1680_p11), %s1684_s11, 16, %s1580_s16, [#allocation7]  }
  0x38   : > { %p1439_p9 = scmp.ne.s32.totalorder %s2055_s4, %s1438_s18  ;;  %p1445_p10 = scmp.lt.u32.totalorder %s1438_s18, %s2055_s4 }
  0x3a   : > { %p1441_p12 = pnand %p1439_p9, %p1696_p13 }
  0x3c   : > { %p1442_p0 = pneg %p1441_p12 }
  0x3e   : > { %p1447_p3 = pnand %p1445_p10, %p1442_p0 }
  0x40   : > { %1450 = shalt.err (!%p1447_p3)
}
  0x41   : > { %s1451_s7 = scalar_lea.vmem %s227_s14, 2048  ;;  %p1459_p5 = scmp.lt.s32.totalorder %s227_s14, %s227_s14 }
  0x42   : > { %p1452_p2 = scmp.ne.s32.totalorder %s227_s14, %s1451_s7  ;;  %p1460_p7 = scmp.lt.s32.totalorder %s1451_s7, %s1451_s7 }
  0x44   : > { %p1454_p1 = pnand %p1452_p2, %p1696_p13  ;;  %p1461_p4 = por %p1460_p7, %p1459_p5 }
  0x46   : > { %p1455_p6 = pneg %p1454_p1 }
  0x48   : > { %p1462_p8 = pnand %p1461_p4, %p1455_p6 }
  0x4a   : > { %1465 = shalt.err (!%p1462_p8)
}
  0x4b   : > { %s1581_s11 = smov 128   ;;  %s1582_s20 = smov 8  }
  0x4c   : > { %1280 = dma.hbm_to_vmem [thread:$0]  (!%p1680_p11), %s2055_s4, 2048, %s227_s14, [#allocation9], %s1581_s11, %s1581_s11, %s1582_s20  }
  0x4d   : > { %s1749_s13 = sadd.s32 1, %s1574_s26   ;;  %s32_s16 = sadd.s32 1, %s1570_s25 }
  0x4e   : > { %s29_s15 = ssub.s32 %s1574_s26, %s1749_s13  ;;  %p39_p8 = scmp.ne.s32.totalorder %s1570_s25, %s1566_s24 }
  0x4f   : > { %p30_p4 = scmp.eq.s32.totalorder %s29_s15, 0  ;;  %p40_p13 = scmp.eq.s32.totalorder %s1574_s26, 0 }
  0x50   : > { %p1292_p9 = scmp.lt.s32.totalorder %s1574_s26, 2  ;;  %p2066_p0 = scmp.eq.s32.totalorder %s1647_s3, 1 }
  0x51   : > { %s1759_s8 = scalar_select %p30_p4, %s1570_s25, %s32_s16  }
  0x52   : > { %p41_p12 = por %p40_p13, %p39_p8  ;;  %p1763_p10 = por %p2066_p0, %p39_p8 }
  0x53   : > { %s243_s17 = sand.u32 1, %s1570_s25   ;;  %s1138_s18 = sshll.u32 %s1574_s26, 10 }
  0x54   : > { %s1110_s14 = sshll.u32 %s243_s17, 6  ;;  %s1772_s22 = scalar_lea.hbm %s2051_s0, %s1138_s18 }
  0x55   : > { %s247_s27 = scalar_lea.vmem [#allocation4], %s1110_s14  ;;  %p1774_p11 = pnand %p1292_p9, %p41_p12 }
  0x56   : > { %s254_s7 = sshll.u32 %s247_s27, 4  ;;  %s1780_s10 = scalar_lea.sflag [#allocation5], %s243_s17  ;;  %s1778_s7 = int_to_ptr.vmem [resolvable:$true] %s254_s7 }
  0x57   : > { %s1466_s15 = scalar_lea.hbm %s1772_s22, 1024  ;;  %p1468_p2 = pneg %p1774_p11 }
  0x58   : > { %p1467_p3 = scmp.ne.s32.totalorder %s1772_s22, %s1466_s15  ;;  %s1471_s14 = scalar_lea.hbm %s2051_s0, 2048 }
  0x59   : > { %p1472_p5 = scmp.lt.u32.totalorder %s1772_s22, %s2051_s0  ;;  %p1473_p7 = scmp.lt.u32.totalorder %s1471_s14, %s1466_s15 }
  0x5a   : > { %p1469_p1 = pnand %p1468_p2, %p1467_p3  ;;  %p1475_p8 = scmp.lt.u32.totalorder %s1466_s15, %s1772_s22 }
  0x5b   : > { %p1474_p4 = por %p1473_p7, %p1472_p5 }
  0x5c   : > { %p1470_p6 = pneg %p1469_p1 }
  0x5d   : > { %p1476_p13 = por %p1475_p8, %p1474_p4 }
  0x5f   : > { %p1477_p9 = pnand %p1476_p13, %p1470_p6 }
  0x61   : > { %1480 = shalt.err (!%p1477_p9)
}
  0x62   : > { %s1481_s17 = scalar_lea.vmem %s1778_s7, 1024  ;;  %s1583_s27 = smov [#allocation4]  }
  0x63   : > { %p1482_p12 = scmp.ne.s32.totalorder %s1778_s7, %s1481_s17  ;;  %s1486_s16 = sshll.u32 %s1583_s27, 4  ;;  %s1487_s16 = int_to_ptr.vmem [resolvable:$false] %s1486_s16 }
  0x64   : > { %s1488_s18 = scalar_lea.vmem %s1487_s16, 2048  ;;  %p1489_p1 = scmp.lt.s32.totalorder %s1778_s7, %s1487_s16 }
  0x65   : > { %p1484_p0 = pnand %p1482_p12, %p1468_p2  ;;  %p1490_p5 = scmp.lt.s32.totalorder %s1488_s18, %s1481_s17 }
  0x67   : > { %p1485_p3 = pneg %p1484_p0  ;;  %p1491_p7 = por %p1490_p5, %p1489_p1 }
  0x69   : > { %p1492_p4 = pnand %p1491_p7, %p1485_p3 }
  0x6b   : > { %1495 = shalt.err (!%p1492_p4)
}
  0x6c   : > { %1284 = dma.hbm_to_vmem [thread:$0]  (!%p1774_p11), %s1772_s22, 1024, %s1778_s7, %s1780_s10, %s1581_s11, %s1581_s11, %s1582_s20  }
  0x6d   : > { %p2069_p2 = scmp.ne.s32.totalorder %s2063_s30, 0 }
  0x6e   : > { %s1814_s15 = sand.u32 (!%p2069_p2), 1, %s1566_s24   ;;  %p2070_p6 = scmp.ne.s32.totalorder (!%p2069_p2), %s2061_s28, 0 }
  0x6f   : > { %266 = sbr.rel (%p2069_p2) target bundleno = 982 (0x3d6), region = 44  ;;  %s1114_s14 = sshll.u32 (!%p2069_p2), %s1814_s15, 6 }
  0x70   : > { %s269_s19 = scalar_lea.sflag (!%p2069_p2), [#allocation5], %s1814_s15  ;;  %s272_s21 = scalar_lea.vmem (!%p2069_p2), [#allocation4], %s1114_s14 }
  0x76   : > { %1541 = dma.done.wait (%p2070_p6), %s269_s19, 1024  }
  0x77   : > { %1543 = vsyncadd (%p2070_p6), %s269_s19, 4294966272  ;;  %p2071_p8 = scmp.eq.s32.totalorder %s1647_s3, 0 }
  0x79   : > { %1545 = dma.done.wait (%p2071_p8), [#allocation9], 1024   ;;  %p2072_p11 = pmov %p2071_p8 }
  0x7a   : > { %p2073_p13 = pmov %p2071_p8 }
  0x7b   : > { %1547 = vsyncadd (%p2072_p11), [#allocation9], 4294966272 }
  0x7c   : > { %1549 = dma.done.wait (%p2073_p13), [#allocation7], 16   ;;  %p2074_p9 = pmov %p2071_p8 }
  0x7d   : > { %p2075_p12 = pmov %p2071_p8 }
  0x7e   : > { %1551 = vsyncadd (%p2074_p9), [#allocation7], 4294967280 }
  0x7f   : > { %1553 = dma.done.wait (%p2075_p12), [#allocation9], 2048   ;;  %p2076_p0 = pmov %p2071_p8 }
  0x81   : > { %1555 = vsyncadd (%p2076_p0), [#allocation9], 4294965248 }
  0x82   : > { %289 = sfence }
  0x83   : > { %v1834_v0 = vld [vmem:[%s272_s21 + $0x10] sm:$0xff]  ;;  %v1836_v1 = vld [vmem:[%s272_s21] sm:$0xff]  ;;  %v1838_v2 = vld [vmem:[%s272_s21 + $0x18] sm:$0xff]  ;;  %v1584_v60 = vmov 0.0   ;;  %s565_s28 = sld [smem:[#allocation10]]  ;;  %s1131_s30 = sld [smem:[#allocation10 + $0x1]] }
  0x84   : > { %v326_v3 = vmul.f32 %v1834_v0, %v1834_v0  ;;  %v324_v4 = vmul.f32 %v1836_v1, %v1836_v1  ;;  %v1844_v5 = vld [vmem:[%s272_s21 + $0x8] sm:$0xff]  ;;  %v1848_v7 = vld [vmem:[%s272_s21 + $0x20] sm:$0xff]  ;;  %v327_v8 = vmul.f32 %v1838_v2, %v1838_v2  ;;  %v1854_v12 = vld [vmem:[%s272_s21 + $0x38] sm:$0xff]  ;;  %543 = vst [vmem:[#allocation2 + $0x20] sm:$0x1] %v1584_v60  ;;  %s1132_s11 = sld [smem:[#allocation10 + $0x2]] }
  0x85   : > { %v1846_v6 = vld [vmem:[%s272_s21 + $0x28] sm:$0xff]  ;;  %v325_v9 = vmul.f32 %v1844_v5, %v1844_v5  ;;  %v1339_v10 = vld [vmem:[#allocation8] sm:$0xff]   ;;  %v1856_v13 = vld [vmem:[%s272_s21 + $0x30] sm:$0xff]  ;;  %v328_v16 = vmul.f32 %v1848_v7, %v1848_v7  ;;  %v331_v17 = vmul.f32 %v1854_v12, %v1854_v12  ;;  %551 = vst [vmem:[#allocation2 + $0x29] sm:$0x1] %v1584_v60  ;;  %s635_s20 = sld [smem:[#allocation3]] }
  0x86   : > { %336 = vadd.xlane.f32.xlu1 %v326_v3  ;;  %332 = vadd.xlane.f32.xlu0 %v324_v4  ;;  %v1340_v11 = vld [vmem:[#allocation8 + $0x8] sm:$0xff]   ;;  %v1341_v14 = vld [vmem:[#allocation8 + $0x10] sm:$0xff]   ;;  %v329_v15 = vmul.f32 %v1846_v6, %v1846_v6  ;;  %v330_v18 = vmul.f32 %v1856_v13, %v1856_v13  ;;  %v1342_v19 = vld [vmem:[#allocation8 + $0x18] sm:$0xff]   ;;  %541 = vst [vmem:[#allocation2] sm:$0x1] %v1584_v60  ;;  %vm1586_vm9 = vmmov 0  }
  0x87   : > { %1172 = vmatprep.subr.bf16.mxu0 %v1339_v10  ;;  %v1343_v20 = vld [vmem:[#allocation8 + $0x20] sm:$0xff]   ;;  %v1344_v21 = vld [vmem:[#allocation8 + $0x28] sm:$0xff]   ;;  %v1345_v22 = vld [vmem:[#allocation8 + $0x30] sm:$0xff]   ;;  %542 = vst [vmem:[#allocation2 + $0x10] sm:$0x1] %v1584_v60  ;;  %1228 = vmatprep.mubr.msk.f32.mxu1 %vm1586_vm9, %v1584_v60  ;;  %vm903_vm10 = vcmask 1041409  }
  0x88   : > { %1173 = vmatpush3.bf16.msra.mxu0 %v1339_v10  ;;  %v1346_v23 = vld [vmem:[#allocation8 + $0x38] sm:$0xff]   ;;  %544 = vst [vmem:[#allocation2 + $0x30] sm:$0x1] %v1584_v60  ;;  %545 = vst [vmem:[#allocation2 + $0x40] sm:$0x1] %v1584_v60  ;;  %vm905_vm11 = vcmask 1042434  }
  0x89   : > { %1174 = vmatprep.subr.bf16.mxu0 %v1340_v11  ;;  %546 = vst [vmem:[#allocation2 + $0x50] sm:$0x1] %v1584_v60  ;;  %547 = vst [vmem:[#allocation2 + $0x60] sm:$0x1] %v1584_v60  ;;  %v1890_v4 = vstv %s565_s28  ;;  %vm907_vm12 = vcmask 1043459   ;;  %vm909_vm13 = vcmask 1044484  }
  0x8a   : > { %338 = vadd.xlane.f32.xlu1 %v327_v8  ;;  %334 = vadd.xlane.f32.xlu0 %v325_v9  ;;  %548 = vst [vmem:[#allocation2 + $0x70] sm:$0x1] %v1584_v60  ;;  %549 = vst [vmem:[#allocation2 + $0x9] sm:$0x1] %v1584_v60  ;;  %v1892_v8 = vstv %s1131_s30  ;;  %v653_v9 = vlaneseq  ;;  %vm911_vm14 = vcmask 1045509   ;;  %vm913_vm15 = vcmask 1046534  }
  0x8b   : > { %550 = vst [vmem:[#allocation2 + $0x19] sm:$0x1] %v1584_v60  ;;  %552 = vst [vmem:[#allocation2 + $0x39] sm:$0x1] %v1584_v60  ;;  %s1118_s22 = sshll.u32 %s1814_s15, 3  ;;  %s1135_s10 = sshll.u32 %s1647_s3, 7 }
  0x8c   : > { %1175 = vmatpush3.bf16.msra.mxu0 %v1340_v11  ;;  %553 = vst [vmem:[#allocation2 + $0x49] sm:$0x1] %v1584_v60  ;;  %554 = vst [vmem:[#allocation2 + $0x59] sm:$0x1] %v1584_v60  ;;  %s313_s17 = scalar_lea.vmem [#allocation12], %s1118_s22  ;;  %s2007_s14 = scalar_lea.hbm %s2057_s6, %s1135_s10 }
  0x8d   : > { %1176 = vmatprep.subr.bf16.mxu0 %v1341_v14  ;;  %555 = vst [vmem:[#allocation2 + $0x69] sm:$0x1] %v1584_v60  ;;  %556 = vst [vmem:[#allocation2 + $0x79] sm:$0x1] %v1584_v60  ;;  %v883_v60 = vld [vmem:[#allocation11 + $0x58] sm:$0xff]  ;;  %s1003_s27 = sshll.u32 %s313_s17, 4  ;;  %s2009_s27 = int_to_ptr.vmem [resolvable:$true] %s1003_s27 }
  0x8e   : > { %342 = vadd.xlane.f32.xlu1 %v329_v15  ;;  %340 = vadd.xlane.f32.xlu0 %v328_v16  ;;  %v1894_v15 = vstv %s1132_s11  ;;  %s990_s19 = scalar_lea.sflag [#allocation6], %s1814_s15  ;;  %s1496_s21 = scalar_lea.vmem %s2009_s27, 128 }
  0x8f   : > { %p1497_p3 = scmp.ne.s32.totalorder %s2009_s27, %s1496_s21  ;;  %s1587_s3 = smov [#allocation12]  }
  0x90   : > { %1177 = vmatpush3.bf16.msra.mxu0 %v1341_v14  ;;  %s1500_s28 = sshll.u32 %s1587_s3, 4  ;;  %s1501_s28 = int_to_ptr.vmem [resolvable:$false] %s1500_s28 }
  0x91   : > { %1178 = vmatprep.subr.bf16.mxu0 %v1342_v19  ;;  %p1498_p1 = pnand %p1497_p3, %p1763_p10  ;;  %s1502_s30 = scalar_lea.vmem %s1501_s28, 256 }
  0x92   : > { %346 = vadd.xlane.f32.xlu1 %v331_v17  ;;  %344 = vadd.xlane.f32.xlu0 %v330_v18  ;;  %p1503_p7 = scmp.lt.s32.totalorder %s2009_s27, %s1501_s28  ;;  %p1504_p4 = scmp.lt.s32.totalorder %s1502_s30, %s1496_s21 }
  0x93   : > { %p1499_p5 = pneg %p1498_p1 }
  0x94   : > { %1179 = vmatpush3.bf16.msra.mxu0 %v1342_v19  ;;  %p1505_p2 = por %p1504_p4, %p1503_p7 }
  0x95   : > { %1180 = vmatprep.subr.bf16.mxu0 %v1343_v20 }
  0x96   : > { %p1506_p6 = pnand %p1505_p2, %p1499_p5 }
  0x98   : > { %1181 = vmatpush3.bf16.msra.mxu0 %v1343_v20 }
  0x99   : > { %1182 = vmatprep.subr.bf16.mxu0 %v1344_v21 }
  0x9c   : > { %1183 = vmatpush3.bf16.msra.mxu0 %v1344_v21 }
  0x9d   : > { %1184 = vmatprep.subr.bf16.mxu0 %v1345_v22 }
  0xa0   : > { %1185 = vmatpush3.bf16.msra.mxu0 %v1345_v22  ;;  %v1898_v22 = vstv %s635_s20 }
  0xa1   : > { %1186 = vmatprep.subr.bf16.mxu0 %v1346_v23 }
  0xa4   : > { %1187 = vmatpush3.bf16.msra.mxu0 %v1346_v23  ;;  %v1900_v23 = vand.u32 127, %v653_v9 }
  0xa6   : > { %vm655_vm8 = vcmp.lt.s32.totalorder %v1900_v23, 8  ;;  %v878_v23 = vld [vmem:[#allocation11 + $0x30] sm:$0xff] }
 0x113   : > { %v337_v24 = vpop.xlane.xlu1 %336  ;;  %v333_v25 = vpop.xlane.xlu0 %332 }
 0x114   : > { %1347 = vrsqrt.f32 %v337_v24  ;;  %vm350_vm0 = vcmp.gt.f32.partialorder %v337_v24, 0.0  ;;  %vm348_vm1 = vcmp.gt.f32.partialorder %v333_v25, 0.0 }
 0x115   : > { %1349 = vrsqrt.f32 %v333_v25 }
 0x117   : > { %v339_v26 = vpop.xlane.xlu1 %338  ;;  %v335_v27 = vpop.xlane.xlu0 %334 }
 0x118   : > { %1351 = vrsqrt.f32 %v339_v26  ;;  %vm351_vm2 = vcmp.gt.f32.partialorder %v339_v26, 0.0  ;;  %vm349_vm3 = vcmp.gt.f32.partialorder %v335_v27, 0.0 }
 0x119   : > { %1353 = vrsqrt.f32 %v335_v27 }
 0x11b   : > { %v343_v28 = vpop.xlane.xlu1 %342  ;;  %v341_v29 = vpop.xlane.xlu0 %340 }
 0x11c   : > { %1355 = vrsqrt.f32 %v343_v28  ;;  %vm353_vm4 = vcmp.gt.f32.partialorder %v343_v28, 0.0  ;;  %vm352_vm5 = vcmp.gt.f32.partialorder %v341_v29, 0.0 }
 0x11d   : > { %1357 = vrsqrt.f32 %v341_v29 }
 0x11e   : > { %v1348_v30 = vpop.eup %1347 }
 0x11f   : > { %v1350_v31 = vpop.eup %1349  ;;  %v347_v32 = vpop.xlane.xlu1 %346  ;;  %v366_v34 = vsel %vm350_vm0, %v1348_v30, 0.0  ;;  %vm915_vm0 = vcmask 1047559  }
 0x120   : > { %v345_v33 = vpop.xlane.xlu0 %344  ;;  %1359 = vrsqrt.f32 %v347_v32  ;;  %v364_v36 = vsel %vm348_vm1, %v1350_v31, 0.0  ;;  %v374_v39 = vmul.f32 %v366_v34, %v1834_v0  ;;  %vm355_vm6 = vcmp.gt.f32.partialorder %v347_v32, 0.0 }
 0x121   : > { %1361 = vrsqrt.f32 %v345_v33  ;;  %v372_v42 = vmul.f32 %v364_v36, %v1836_v1  ;;  %vm354_vm7 = vcmp.gt.f32.partialorder %v345_v33, 0.0 }
 0x122   : > { %v1352_v35 = vpop.eup %1351 }
 0x123   : > { %v1354_v37 = vpop.eup %1353  ;;  %v367_v38 = vsel %vm351_vm2, %v1352_v35, 0.0 }
 0x124   : > { %v375_v40 = vmul.f32 %v367_v38, %v1838_v2  ;;  %v365_v41 = vsel %vm349_vm3, %v1354_v37, 0.0 }
 0x125   : > { %v373_v43 = vmul.f32 %v365_v41, %v1844_v5 }
 0x126   : > { %v1356_v44 = vpop.eup %1355  ;;  %v1140_v45 = vpack.c.bf16 %v375_v40, %v374_v39 }
 0x127   : > { %v1358_v46 = vpop.eup %1357  ;;  %v369_v47 = vsel %vm353_vm4, %v1356_v44, 0.0  ;;  %v1139_v48 = vpack.c.bf16 %v373_v43, %v372_v42 }
 0x128   : > { %v377_v49 = vmul.f32 %v369_v47, %v1846_v6  ;;  %v368_v50 = vsel %vm352_vm5, %v1358_v46, 0.0 }
 0x129   : > { %v376_v51 = vmul.f32 %v368_v50, %v1848_v7  ;;  %1188 = vmatprep.mubr.bf16.mxu0 %v1139_v48 }
 0x12a   : > { %v1360_v52 = vpop.eup %1359  ;;  %1189 = vmatmul.mubr.bf16.vlgmr.msra.gmra.mrb[0].mxu0 %v1140_v45 }
 0x12b   : > { %v1362_v53 = vpop.eup %1361  ;;  %v371_v54 = vsel %vm355_vm6, %v1360_v52, 0.0  ;;  %v1141_v55 = vpack.c.bf16 %v377_v49, %v376_v51 }
 0x12c   : > { %v379_v56 = vmul.f32 %v371_v54, %v1854_v12  ;;  %v370_v57 = vsel %vm354_vm7, %v1362_v53, 0.0 }
 0x12d   : > { %v378_v58 = vmul.f32 %v370_v57, %v1856_v13  ;;  %1192 = vmatprep.mubr.bf16.mxu0 %v1141_v55 }
 0x12f   : > { %v1142_v59 = vpack.c.bf16 %v379_v56, %v378_v58 }
 0x132   : > { %1193 = vmatmul.mubr.bf16.gmra.mrb[4].mxu0 %v1142_v59 }
 0x1fd   : > { %v1190_v61 = vpop.f32.mrb[0].mxu0 }
 0x1fe   : > { %559 = vst [vmem:[#allocation2 + $0x21] sm:$0xff] %v1190_v61  ;;  %v510_v62 = vpop.f32.mrb[1].mxu0  ;;  %v595_v18 = vmul.f32 %v1190_v61, %v1892_v8 }
 0x1ff   : > { %557 = vst [vmem:[#allocation2 + $0x1] sm:$0xff] %v510_v62  ;;  %v1191_v63 = vpop.f32.mrb[2].mxu0  ;;  %v593_v27 = vmul.f32 %v1892_v8, %v510_v62 }
 0x200   : > { %560 = vst [vmem:[#allocation2 + $0x31] sm:$0xff] %v1191_v63  ;;  %v513_v3 = vpop.f32.mrb[3].mxu0  ;;  %v596_v32 = vmul.f32 %v1191_v63, %v1892_v8 }
 0x201   : > { %558 = vst [vmem:[#allocation2 + $0x11] sm:$0xff] %v513_v3  ;;  %v594_v38 = vmul.f32 %v1892_v8, %v513_v3 }
 0x205   : > { %v1194_v10 = vpop.f32.mrb[4].mxu0  ;;  %v568_v11 = vld [vmem:[#allocation2 + $0x20] sm:$0xff] }
 0x206   : > { %v612_v14 = vld [vmem:[#allocation2 + $0x22] sm:$0xff]  ;;  %563 = vst [vmem:[#allocation2 + $0x61] sm:$0xff] %v1194_v10  ;;  %v526_v16 = vpop.f32.mrb[5].mxu0  ;;  %v577_v17 = vmul.f32 %v1890_v4, %v568_v11  ;;  %v599_v51 = vmul.f32 %v1194_v10, %v1892_v8 }
 0x207   : > { %v566_v19 = vld [vmem:[#allocation2] sm:$0xff]  ;;  %561 = vst [vmem:[#allocation2 + $0x41] sm:$0xff] %v526_v16  ;;  %v1195_v21 = vpop.f32.mrb[6].mxu0  ;;  %v569_v24 = vld [vmem:[#allocation2 + $0x30] sm:$0xff]  ;;  %v621_v30 = vmul.f32 %v1894_v15, %v612_v14  ;;  %v597_v49 = vmul.f32 %v1892_v8, %v526_v16 }
 0x208   : > { %v610_v20 = vld [vmem:[#allocation2 + $0x2] sm:$0xff]  ;;  %v613_v25 = vld [vmem:[#allocation2 + $0x32] sm:$0xff]  ;;  %v575_v26 = vmul.f32 %v1890_v4, %v566_v19  ;;  %564 = vst [vmem:[#allocation2 + $0x71] sm:$0xff] %v1195_v21  ;;  %v529_v28 = vpop.f32.mrb[7].mxu0  ;;  %v603_v29 = vadd.f32 %v595_v18, %v577_v17  ;;  %v578_v31 = vmul.f32 %v1890_v4, %v569_v24  ;;  %v600_v58 = vmul.f32 %v1195_v21, %v1892_v8 }
 0x209   : > { %v567_v33 = vld [vmem:[#allocation2 + $0x10] sm:$0xff]  ;;  %562 = vst [vmem:[#allocation2 + $0x51] sm:$0xff] %v529_v28  ;;  %v619_v36 = vmul.f32 %v1894_v15, %v610_v20  ;;  %v622_v41 = vmul.f32 %v1894_v15, %v613_v25  ;;  %v598_v24 = vmul.f32 %v1892_v8, %v529_v28 }
 0x20a   : > { %v611_v34 = vld [vmem:[#allocation2 + $0x12] sm:$0xff]  ;;  %v601_v35 = vadd.f32 %v593_v27, %v575_v26  ;;  %v576_v37 = vmul.f32 %v1890_v4, %v567_v33  ;;  %v629_v39 = vadd.f32 %v621_v30, %v603_v29  ;;  %v604_v40 = vadd.f32 %v596_v32, %v578_v31 }
 0x20b   : > { %v620_v44 = vmul.f32 %v1894_v15, %v611_v34 }
 0x20c   : > { %v627_v42 = vadd.f32 %v619_v36, %v601_v35  ;;  %v602_v43 = vadd.f32 %v594_v38, %v576_v37  ;;  %v639_v45 = vadd.f32 %v1898_v22, %v629_v39  ;;  %v630_v46 = vadd.f32 %v622_v41, %v604_v40 }
 0x20d   : > { %v572_v50 = vld [vmem:[#allocation2 + $0x60] sm:$0xff] }
 0x20e   : > { %v637_v47 = vadd.f32 %v1898_v22, %v627_v42  ;;  %v628_v48 = vadd.f32 %v620_v44, %v602_v43  ;;  %v616_v52 = vld [vmem:[#allocation2 + $0x62] sm:$0xff]  ;;  %v647_v53 = vmax.f32 %v639_v45, 0.0  ;;  %v640_v54 = vadd.f32 %v1898_v22, %v630_v46 }
 0x20f   : > { %v570_v55 = vld [vmem:[#allocation2 + $0x40] sm:$0xff]  ;;  %v581_v57 = vmul.f32 %v1890_v4, %v572_v50  ;;  %v625_v63 = vmul.f32 %v1894_v15, %v616_v52  ;;  %v573_v3 = vld [vmem:[#allocation2 + $0x70] sm:$0xff]  ;;  %v873_v46 = vld [vmem:[#allocation11 + $0x8] sm:$0xff] }
 0x210   : > { %v614_v56 = vld [vmem:[#allocation2 + $0x42] sm:$0xff]  ;;  %v645_v59 = vmax.f32 %v637_v47, 0.0  ;;  %v638_v61 = vadd.f32 %v1898_v22, %v628_v48  ;;  %v579_v62 = vmul.f32 %v1890_v4, %v570_v55  ;;  %v658_v9 = vsel %vm655_vm8, %v647_v53, 0.0  ;;  %v571_v11 = vld [vmem:[#allocation2 + $0x50] sm:$0xff]  ;;  %v875_v50 = vld [vmem:[#allocation11 + $0x18] sm:$0xff] }
 0x211   : > { %v648_v10 = vmax.f32 %v640_v54, 0.0  ;;  %v615_v14 = vld [vmem:[#allocation2 + $0x52] sm:$0xff]  ;;  %v607_v16 = vadd.f32 %v599_v51, %v581_v57  ;;  %v582_v17 = vmul.f32 %v1890_v4, %v573_v3  ;;  %668 = vmax.xlane.f32.xlu0 %v658_v9  ;;  %v623_v20 = vmul.f32 %v1894_v15, %v614_v56  ;;  %v876_v52 = vld [vmem:[#allocation11 + $0x20] sm:$0xff]  ;;  %v877_v53 = vld [vmem:[#allocation11 + $0x28] sm:$0xff] }
 0x212   : > { %v617_v18 = vld [vmem:[#allocation2 + $0x72] sm:$0xff]  ;;  %v605_v19 = vadd.f32 %v597_v49, %v579_v62  ;;  %v580_v21 = vmul.f32 %v1890_v4, %v571_v11  ;;  %v646_v26 = vmax.f32 %v638_v61, 0.0  ;;  %v624_v32 = vmul.f32 %v1894_v15, %v615_v14  ;;  %v880_v57 = vld [vmem:[#allocation11 + $0x40] sm:$0xff]  ;;  %v885_v3 = vld [vmem:[#allocation11 + $0x68] sm:$0xff] }
 0x213   : > { %v659_v25 = vsel %vm655_vm8, %v648_v10, 0.0  ;;  %v633_v27 = vadd.f32 %v625_v63, %v607_v16  ;;  %v608_v29 = vadd.f32 %v600_v58, %v582_v17  ;;  %v626_v33 = vmul.f32 %v1894_v15, %v617_v18  ;;  %v874_v47 = vld [vmem:[#allocation11 + $0x10] sm:$0xff]  ;;  %v879_v55 = vld [vmem:[#allocation11 + $0x38] sm:$0xff]  ;;  %v881_v58 = vld [vmem:[#allocation11 + $0x48] sm:$0xff] }
 0x214   : > { %670 = vmax.xlane.f32.xlu1 %v659_v25  ;;  %v631_v30 = vadd.f32 %v623_v20, %v605_v19  ;;  %v606_v31 = vadd.f32 %v598_v24, %v580_v21  ;;  %v656_v34 = vsel %vm655_vm8, %v645_v59, 0.0  ;;  %v657_v36 = vsel %vm655_vm8, %v646_v26, 0.0  ;;  %v882_v61 = vld [vmem:[#allocation11 + $0x50] sm:$0xff]  ;;  %v884_v63 = vld [vmem:[#allocation11 + $0x60] sm:$0xff]  ;;  %v887_v11 = vld [vmem:[#allocation11 + $0x78] sm:$0xff] }
 0x215   : > { %664 = vmax.xlane.f32.xlu0 %v656_v34  ;;  %v643_v28 = vadd.f32 %v1898_v22, %v633_v27  ;;  %v634_v35 = vadd.f32 %v626_v33, %v608_v29  ;;  %v1585_v48 = vmov 0.0|0.0   ;;  %v1235_v51 = vpack.c.bf16 %v875_v50, %v874_v47  ;;  %v886_v10 = vld [vmem:[#allocation11 + $0x70] sm:$0xff] }
 0x216   : > { %v641_v4 = vadd.f32 %v1898_v22, %v631_v30  ;;  %v632_v8 = vadd.f32 %v624_v32, %v606_v31  ;;  %1231 = vmatprep.subr.bf16.mxu1 %v1585_v48  ;;  %v1238_v54 = vpack.c.bf16 %v877_v53, %v876_v52  ;;  %v1241_v56 = vpack.c.bf16 %v879_v55, %v878_v23 }
 0x217   : > { %v644_v39 = vadd.f32 %v1898_v22, %v634_v35  ;;  %v651_v41 = vmax.f32 %v643_v28, 0.0  ;;  %v1244_v59 = vpack.c.bf16 %v881_v58, %v880_v57  ;;  %v1247_v62 = vpack.c.bf16 %v883_v60, %v882_v61 }
 0x218   : > { %666 = vmax.xlane.f32.xlu1 %v657_v36  ;;  %v649_v37 = vmax.f32 %v641_v4, 0.0  ;;  %v642_v38 = vadd.f32 %v1898_v22, %v632_v8  ;;  %v872_v22 = vld [vmem:[#allocation11] sm:$0xff]  ;;  %v1250_v9 = vpack.c.bf16 %v885_v3, %v884_v63  ;;  %v1253_v14 = vpack.c.bf16 %v887_v11, %v886_v10 }
 0x219   : > { %v652_v43 = vmax.f32 %v644_v39, 0.0  ;;  %v662_v44 = vsel %vm655_vm8, %v651_v41, 0.0  ;;  %v1232_v49 = vpack.c.bf16 %v873_v46, %v872_v22 }
 0x21a   : > { %v660_v15 = vsel %vm655_vm8, %v649_v37, 0.0  ;;  %v650_v40 = vmax.f32 %v642_v38, 0.0 }
 0x21b   : > { %672 = vmax.xlane.f32.xlu0 %v660_v15  ;;  %v663_v45 = vsel %vm655_vm8, %v652_v43, 0.0  ;;  %1233 = vmatpush3.bf16.msra.mxu1 %v1232_v49 }
 0x21c   : > { %v661_v42 = vsel %vm655_vm8, %v650_v40, 0.0  ;;  %1234 = vmatprep.subr.bf16.mxu1 %v1585_v48 }
 0x21d   : > { %674 = vmax.xlane.f32.xlu1 %v661_v42 }
 0x21f   : > { %676 = vmax.xlane.f32.xlu0 %v662_v44  ;;  %1236 = vmatpush3.bf16.msra.mxu1 %v1235_v51 }
 0x220   : > { %1237 = vmatprep.subr.bf16.mxu1 %v1585_v48 }
 0x221   : > { %678 = vmax.xlane.f32.xlu1 %v663_v45 }
 0x223   : > { %1239 = vmatpush3.bf16.msra.mxu1 %v1238_v54 }
 0x224   : > { %1240 = vmatprep.subr.bf16.mxu1 %v1585_v48 }
 0x227   : > { %1242 = vmatpush3.bf16.msra.mxu1 %v1241_v56 }
 0x228   : > { %1243 = vmatprep.subr.bf16.mxu1 %v1585_v48 }
 0x22b   : > { %1245 = vmatpush3.bf16.msra.mxu1 %v1244_v59 }
 0x22c   : > { %1246 = vmatprep.subr.bf16.mxu1 %v1585_v48 }
 0x22f   : > { %1248 = vmatpush3.bf16.msra.mxu1 %v1247_v62 }
 0x230   : > { %1249 = vmatprep.subr.bf16.mxu1 %v1585_v48 }
 0x233   : > { %1251 = vmatpush3.bf16.msra.mxu1 %v1250_v9 }
 0x234   : > { %1252 = vmatprep.subr.bf16.mxu1 %v1585_v48 }
 0x237   : > { %1254 = vmatpush3.bf16.msra.mxu1 %v1253_v14 }
 0x29e   : > { %v669_v16 = vpop.xlane.xlu0 %668 }
 0x29f   : > { %v692_v17 = vrot.slane %v669_v16, 4 }
 0x2a1   : > { %v671_v18 = vpop.xlane.xlu1 %670  ;;  %v693_v19 = vmax.f32 %v669_v16, %v692_v17 }
 0x2a2   : > { %v698_v20 = vrot.slane %v671_v18, 4  ;;  %v665_v21 = vpop.xlane.xlu0 %664 }
 0x2a3   : > { %v694_v24 = vrot.slane %v693_v19, 2  ;;  %v680_v26 = vrot.slane %v665_v21, 4 }
 0x2a4   : > { %v699_v25 = vmax.f32 %v671_v18, %v698_v20 }
 0x2a5   : > { %v667_v27 = vpop.xlane.xlu1 %666  ;;  %v695_v29 = vmax.f32 %v693_v19, %v694_v24  ;;  %v681_v31 = vmax.f32 %v665_v21, %v680_v26 }
 0x2a6   : > { %v700_v30 = vrot.slane %v699_v25, 2  ;;  %v686_v32 = vrot.slane %v667_v27, 4 }
 0x2a7   : > { %v696_v33 = vrot.slane %v695_v29, 1  ;;  %v682_v4 = vrot.slane %v681_v31, 2 }
 0x2a8   : > { %v701_v34 = vmax.f32 %v699_v25, %v700_v30  ;;  %v687_v8 = vmax.f32 %v667_v27, %v686_v32  ;;  %v673_v28 = vpop.xlane.xlu0 %672 }
 0x2a9   : > { %v704_v35 = vrot.slane %v673_v28, 4  ;;  %v697_v36 = vmax.f32 %v695_v29, %v696_v33  ;;  %v683_v38 = vmax.f32 %v681_v31, %v682_v4 }
 0x2aa   : > { %v702_v37 = vrot.slane %v701_v34, 1  ;;  %v688_v39 = vrot.slane %v687_v8, 2  ;;  %v675_v15 = vpop.xlane.xlu1 %674 }
 0x2ab   : > { %v705_v40 = vmax.f32 %v673_v28, %v704_v35  ;;  %v710_v41 = vrot.slane %v675_v15, 4  ;;  %v730_v42 = vsub.f32 %v669_v16, %v697_v36  ;;  %v684_v44 = vrot.slane %v683_v38, 1 }
 0x2ac   : > { %v703_v43 = vmax.f32 %v701_v34, %v702_v37  ;;  %v689_v45 = vmax.f32 %v687_v8, %v688_v39  ;;  %v677_v22 = vpop.xlane.xlu0 %676 }
 0x2ad   : > { %v706_v46 = vrot.slane %v705_v40, 2  ;;  %v711_v47 = vmax.f32 %v675_v15, %v710_v41  ;;  %v716_v48 = vrot.slane %v677_v22, 4  ;;  %v740_v49 = vmul.f32 1.442695, %v730_v42 }
 0x2ae   : > { %v731_v50 = vsub.f32 %v671_v18, %v703_v43  ;;  %v685_v51 = vmax.f32 %v683_v38, %v684_v44  ;;  %v690_v52 = vrot.slane %v689_v45, 1  ;;  %v679_v53 = vpop.xlane.xlu1 %678 }
 0x2af   : > { %v707_v54 = vmax.f32 %v705_v40, %v706_v46  ;;  %v712_v23 = vrot.slane %v711_v47, 2  ;;  %v717_v55 = vmax.f32 %v677_v22, %v716_v48  ;;  %v722_v56 = vrot.slane %v679_v53, 4 }
 0x2b0   : > { %1363 = vpow2.f32 %v740_v49  ;;  %v742_v57 = vmul.f32 1.442695, %v731_v50  ;;  %v728_v58 = vsub.f32 %v665_v21, %v685_v51  ;;  %v691_v59 = vmax.f32 %v689_v45, %v690_v52 }
 0x2b1   : > { %v708_v61 = vrot.slane %v707_v54, 1  ;;  %v713_v60 = vmax.f32 %v711_v47, %v712_v23  ;;  %v718_v62 = vrot.slane %v717_v55, 2  ;;  %v723_v63 = vmax.f32 %v679_v53, %v722_v56 }
 0x2b2   : > { %1365 = vpow2.f32 %v742_v57  ;;  %v736_v3 = vmul.f32 1.442695, %v728_v58  ;;  %v729_v9 = vsub.f32 %v667_v27, %v691_v59 }
 0x2b3   : > { %v709_v10 = vmax.f32 %v707_v54, %v708_v61  ;;  %v714_v11 = vrot.slane %v713_v60, 1  ;;  %v719_v14 = vmax.f32 %v717_v55, %v718_v62  ;;  %v724_v16 = vrot.slane %v723_v63, 2 }
 0x2b4   : > { %1367 = vpow2.f32 %v736_v3  ;;  %v738_v17 = vmul.f32 1.442695, %v729_v9 }
 0x2b5   : > { %v732_v18 = vsub.f32 %v673_v28, %v709_v10  ;;  %v715_v19 = vmax.f32 %v713_v60, %v714_v11  ;;  %v720_v20 = vrot.slane %v719_v14, 1  ;;  %v725_v24 = vmax.f32 %v723_v63, %v724_v16 }
 0x2b6   : > { %1369 = vpow2.f32 %v738_v17 }
 0x2b7   : > { %v744_v21 = vmul.f32 1.442695, %v732_v18  ;;  %v733_v25 = vsub.f32 %v675_v15, %v715_v19  ;;  %v721_v26 = vmax.f32 %v719_v14, %v720_v20  ;;  %v726_v29 = vrot.slane %v725_v24, 1 }
 0x2b9   : > { %1371 = vpow2.f32 %v744_v21  ;;  %v746_v30 = vmul.f32 1.442695, %v733_v25  ;;  %v734_v31 = vsub.f32 %v677_v22, %v721_v26  ;;  %v727_v32 = vmax.f32 %v725_v24, %v726_v29 }
 0x2ba   : > { %v1950_v27 = vpop.eup %1363 }
 0x2bb   : > { %v764_v33 = vrot.slane %v1950_v27, 4  ;;  %1373 = vpow2.f32 %v746_v30  ;;  %v748_v34 = vmul.f32 1.442695, %v734_v31  ;;  %v735_v4 = vsub.f32 %v679_v53, %v727_v32 }
 0x2bc   : > { %v1953_v8 = vpop.eup %1365 }
 0x2bd   : > { %v765_v28 = vadd.f32 %v1950_v27, %v764_v33  ;;  %v770_v35 = vrot.slane %v1953_v8, 4  ;;  %1375 = vpow2.f32 %v748_v34  ;;  %v750_v36 = vmul.f32 1.442695, %v735_v4 }
 0x2be   : > { %v1957_v37 = vpop.eup %1367 }
 0x2bf   : > { %v766_v38 = vrot.slane %v765_v28, 2  ;;  %v771_v39 = vadd.f32 %v1953_v8, %v770_v35  ;;  %v752_v15 = vrot.slane %v1957_v37, 4  ;;  %1377 = vpow2.f32 %v750_v36 }
 0x2c0   : > { %v1961_v40 = vpop.eup %1369 }
 0x2c1   : > { %v767_v41 = vadd.f32 %v766_v38, %v765_v28  ;;  %v772_v42 = vrot.slane %v771_v39, 2  ;;  %v753_v43 = vadd.f32 %v1957_v37, %v752_v15  ;;  %v758_v44 = vrot.slane %v1961_v40, 4 }
 0x2c3   : > { %v1965_v45 = vpop.eup %1371  ;;  %v768_v22 = vrot.slane %v767_v41, 1  ;;  %v773_v46 = vadd.f32 %v772_v42, %v771_v39  ;;  %v754_v47 = vrot.slane %v753_v43, 2  ;;  %v759_v48 = vadd.f32 %v1961_v40, %v758_v44 }
 0x2c4   : > { %v776_v49 = vrot.slane %v1965_v45, 4 }
 0x2c5   : > { %v1969_v50 = vpop.eup %1373  ;;  %v769_v51 = vadd.f32 %v768_v22, %v767_v41  ;;  %v774_v52 = vrot.slane %v773_v46, 1  ;;  %v755_v53 = vadd.f32 %v754_v47, %v753_v43  ;;  %v760_v54 = vrot.slane %v759_v48, 2 }
 0x2c6   : > { %v777_v23 = vadd.f32 %v1965_v45, %v776_v49  ;;  %v782_v55 = vrot.slane %v1969_v50, 4 }
 0x2c7   : > { %v1973_v56 = vpop.eup %1375  ;;  %1379 = vrcp.f32 %v769_v51  ;;  %v775_v57 = vadd.f32 %v774_v52, %v773_v46  ;;  %v756_v58 = vrot.slane %v755_v53, 1  ;;  %v761_v59 = vadd.f32 %v760_v54, %v759_v48 }
 0x2c8   : > { %v778_v61 = vrot.slane %v777_v23, 2  ;;  %v783_v60 = vadd.f32 %v1969_v50, %v782_v55  ;;  %v788_v62 = vrot.slane %v1973_v56, 4 }
 0x2c9   : > { %v1977_v63 = vpop.eup %1377  ;;  %1381 = vrcp.f32 %v775_v57  ;;  %v757_v3 = vadd.f32 %v756_v58, %v755_v53  ;;  %v762_v9 = vrot.slane %v761_v59, 1 }
 0x2ca   : > { %v779_v10 = vadd.f32 %v778_v61, %v777_v23  ;;  %v784_v11 = vrot.slane %v783_v60, 2  ;;  %v789_v14 = vadd.f32 %v1973_v56, %v788_v62  ;;  %v794_v16 = vrot.slane %v1977_v63, 4 }
 0x2cb   : > { %1383 = vrcp.f32 %v757_v3  ;;  %v763_v17 = vadd.f32 %v762_v9, %v761_v59 }
 0x2cc   : > { %v780_v18 = vrot.slane %v779_v10, 1  ;;  %v785_v19 = vadd.f32 %v784_v11, %v783_v60  ;;  %v790_v20 = vrot.slane %v789_v14, 2  ;;  %v795_v24 = vadd.f32 %v1977_v63, %v794_v16 }
 0x2cd   : > { %1385 = vrcp.f32 %v763_v17 }
 0x2ce   : > { %v791_v21 = vadd.f32 %v790_v20, %v789_v14  ;;  %v796_v25 = vrot.slane %v795_v24, 2  ;;  %v781_v26 = vadd.f32 %v780_v18, %v779_v10  ;;  %v786_v29 = vrot.slane %v785_v19, 1 }
 0x2d0   : > { %v787_v30 = vadd.f32 %v786_v29, %v785_v19  ;;  %v792_v31 = vrot.slane %v791_v21, 1  ;;  %v797_v32 = vadd.f32 %v796_v25, %v795_v24  ;;  %1387 = vrcp.f32 %v781_v26 }
 0x2d1   : > { %v1380_v33 = vpop.eup %1379 }
 0x2d2   : > { %v793_v34 = vadd.f32 %v792_v31, %v791_v21  ;;  %v798_v4 = vrot.slane %v797_v32, 1  ;;  %1389 = vrcp.f32 %v787_v30  ;;  %v810_v28 = vmul.f32 %v1380_v33, %v1950_v27 }
 0x2d3   : > { %v1382_v35 = vpop.eup %1381 }
 0x2d4   : > { %v799_v36 = vadd.f32 %v798_v4, %v797_v32  ;;  %1391 = vrcp.f32 %v793_v34  ;;  %v811_v38 = vmul.f32 %v1382_v35, %v1953_v8  ;;  %v818_v39 = vmul.f32 %v810_v28, %v1834_v0 }
 0x2d5   : > { %v1384_v15 = vpop.eup %1383 }
 0x2d6   : > { %1393 = vrcp.f32 %v799_v36  ;;  %v808_v41 = vmul.f32 %v1384_v15, %v1957_v37  ;;  %v819_v42 = vmul.f32 %v811_v38, %v1838_v2  ;;  %v836_v43 = vrot.slane %v818_v39, 4 }
 0x2d7   : > { %v1386_v44 = vpop.eup %1385 }
 0x2d8   : > { %v809_v22 = vmul.f32 %v1386_v44, %v1961_v40  ;;  %v816_v46 = vmul.f32 %v808_v41, %v1836_v1  ;;  %v837_v27 = vadd.f32 %v836_v43, %v818_v39  ;;  %v842_v47 = vrot.slane %v819_v42, 4 }
 0x2da   : > { %v1388_v48 = vpop.eup %1387  ;;  %v817_v49 = vmul.f32 %v809_v22, %v1844_v5  ;;  %v824_v8 = vrot.slane %v816_v46, 4  ;;  %v843_v51 = vadd.f32 %v842_v47, %v819_v42  ;;  %v838_v54 = vrot.slane %v837_v27, 2 }
 0x2db   : > { %v812_v0 = vmul.f32 %v1388_v48, %v1965_v45 }
 0x2dc   : > { %v1390_v52 = vpop.eup %1389  ;;  %v825_v53 = vadd.f32 %v824_v8, %v816_v46  ;;  %v830_v37 = vrot.slane %v817_v49, 4  ;;  %v844_v2 = vrot.slane %v843_v51, 2  ;;  %v839_v62 = vadd.f32 %v838_v54, %v837_v27 }
 0x2dd   : > { %v813_v23 = vmul.f32 %v1390_v52, %v1969_v50  ;;  %v820_v40 = vmul.f32 %v812_v0, %v1848_v7 }
 0x2de   : > { %v1392_v55 = vpop.eup %1391  ;;  %v826_v1 = vrot.slane %v825_v53, 2  ;;  %v831_v57 = vadd.f32 %v830_v37, %v817_v49  ;;  %v845_v3 = vadd.f32 %v844_v2, %v843_v51  ;;  %v840_v19 = vrot.slane %v839_v62, 1  ;;  %v1133_v49 = vld [vmem:[%s2056_s5] ss:$0 sm:$0xff] }
 0x2df   : > { %v814_v58 = vmul.f32 %v1392_v55, %v1973_v56  ;;  %v821_v5 = vmul.f32 %v813_v23, %v1846_v6  ;;  %v848_v59 = vrot.slane %v820_v40, 4 }
 0x2e0   : > { %v1394_v61 = vpop.eup %1393  ;;  %v827_v60 = vadd.f32 %v826_v1, %v825_v53  ;;  %v832_v45 = vrot.slane %v831_v57, 2  ;;  %v846_v20 = vrot.slane %v845_v3, 1 }
 0x2e1   : > { %v815_v9 = vmul.f32 %v1394_v61, %v1977_v63  ;;  %v822_v10 = vmul.f32 %v814_v58, %v1856_v13  ;;  %v849_v50 = vadd.f32 %v848_v59, %v820_v40  ;;  %v854_v11 = vrot.slane %v821_v5, 4 }
 0x2e2   : > { %v828_v7 = vrot.slane %v827_v60, 1  ;;  %v833_v14 = vadd.f32 %v832_v45, %v831_v57  ;;  %v847_v33 = vadd.f32 %v846_v20, %v845_v3 }
 0x2e3   : > { %v823_v16 = vmul.f32 %v815_v9, %v1854_v12  ;;  %v850_v17 = vrot.slane %v849_v50, 2  ;;  %v855_v56 = vadd.f32 %v854_v11, %v821_v5  ;;  %v860_v18 = vrot.slane %v822_v10, 4 }
 0x2e4   : > { %v834_v6 = vrot.slane %v833_v14, 1  ;;  %v829_v63 = vadd.f32 %v828_v7, %v827_v60  ;;  %v841_v12 = vadd.f32 %v840_v19, %v839_v62 }
 0x2e5   : > { %v851_v24 = vadd.f32 %v850_v17, %v849_v50  ;;  %v856_v21 = vrot.slane %v855_v56, 2  ;;  %v861_v25 = vadd.f32 %v860_v18, %v822_v10  ;;  %v866_v26 = vrot.slane %v823_v16, 4 }
 0x2e6   : > { %v835_v29 = vadd.f32 %v834_v6, %v833_v14 }
 0x2e7   : > { %v852_v13 = vrot.slane %v851_v24, 1  ;;  %v857_v30 = vadd.f32 %v856_v21, %v855_v56  ;;  %v862_v31 = vrot.slane %v861_v25, 2  ;;  %v867_v32 = vadd.f32 %v866_v26, %v823_v16 }
 0x2e8   : > { %v904_v34 = vsel %vm903_vm10, %v835_v29, %v829_v63 }
 0x2e9   : > { %v853_v4 = vadd.f32 %v852_v13, %v851_v24  ;;  %v858_v28 = vrot.slane %v857_v30, 1  ;;  %v863_v35 = vadd.f32 %v862_v31, %v861_v25  ;;  %v868_v36 = vrot.slane %v867_v32, 2 }
 0x2ea   : > { %v906_v38 = vsel %vm905_vm11, %v841_v12, %v904_v34 }
 0x2eb   : > { %v859_v39 = vadd.f32 %v858_v28, %v857_v30  ;;  %v864_v15 = vrot.slane %v863_v35, 1  ;;  %v869_v41 = vadd.f32 %v868_v36, %v867_v32  ;;  %v908_v42 = vsel %vm907_vm12, %v847_v33, %v906_v38 }
 0x2ec   : > { %v910_v43 = vsel %vm909_vm13, %v853_v4, %v908_v42 }
 0x2ed   : > { %v865_v44 = vadd.f32 %v864_v15, %v863_v35  ;;  %v870_v22 = vrot.slane %v869_v41, 1  ;;  %v912_v46 = vsel %vm911_vm14, %v859_v39, %v910_v43 }
 0x2ef   : > { %v871_v27 = vadd.f32 %v870_v22, %v869_v41  ;;  %v914_v47 = vsel %vm913_vm15, %v865_v44, %v912_v46 }
 0x2f1   : > { %v916_v48 = vsel %vm915_vm0, %v871_v27, %v914_v47 }
 0x2f2   : > { %1229 = vmatmul.mubr.f32.vlgmr.msra.gmra.mrb[0].mxu1 %v916_v48 }
 0x3c5   : > { %v984_v8 = vpop.f32.mrb[0].mxu1 }
 0x3c6   : > { %v985_v51 = vadd.f32 %v1133_v49, %v984_v8  ;;  %v1230_v0 = vpop.f32.mrb[1].mxu1 }
 0x3c8   : > { %988 = vst [vmem:[%s313_s17] sm:$0xff] %v985_v51 }
 0x3c9   : > { %1509 = shalt.err (!%p1506_p6)
}
 0x3ca   : > { %s1510_s15 = scalar_lea.hbm %s2007_s14, 128  ;;  %s1514_s22 = scalar_lea.hbm %s2057_s6, 256 }
 0x3cb   : > { %p1511_p8 = scmp.ne.s32.totalorder %s2007_s14, %s1510_s15  ;;  %p1515_p9 = scmp.lt.u32.totalorder %s2007_s14, %s2057_s6 }
 0x3cc   : > { %p1516_p12 = scmp.lt.u32.totalorder %s1514_s22, %s1510_s15  ;;  %p1518_p3 = scmp.lt.u32.totalorder %s1510_s15, %s2007_s14 }
 0x3cd   : > { %p1512_p11 = pnand %p1511_p8, %p1763_p10 }
 0x3ce   : > { %p1517_p0 = por %p1516_p12, %p1515_p9 }
 0x3cf   : > { %p1513_p13 = pneg %p1512_p11 }
 0x3d0   : > { %p1519_p1 = por %p1518_p3, %p1517_p0 }
 0x3d2   : > { %p1520_p5 = pnand %p1519_p1, %p1513_p13 }
 0x3d4   : > { %1523 = shalt.err (!%p1520_p5)
}
 0x3d5   : > { %1269 = dma.vmem_to_hbm [thread:$0]  (%p1763_p10), %s2009_s27, 128, %s2007_s14, %s990_s19  }
 0x3d6 PF: > { %s1015_s10 = sand.u32 1, %s1562_s23   ;;  %p2077_p7 = scmp.ne.s32.totalorder %s2062_s29, 0 }
 0x3d7   : > { %p2078_p4 = scmp.ge.s32.totalorder %s1574_s26, 2  ;;  %s1016_s17 = scalar_lea.sflag [#allocation6], %s1015_s10 }
 0x3d9   : > { %p1286_p2 = pnand %p2078_p4, %p2077_p7 }
 0x3db   : > { %1557 = dma.done.wait (!%p1286_p2), %s1016_s17, 128  }
 0x3dc   : > { %1559 = vsyncadd (!%p1286_p2), %s1016_s17, 4294967168  ;;  %p22_p6 = scmp.ge.s32.totalorder %s1749_s13, 4   ;;  %s2079_s23 = smov %s1566_s24 }
 0x3dd   : > { %s2080_s24 = smov %s1570_s25  ;;  %s2081_s25 = smov %s1759_s8 }
 0x3de   : > { %s2082_s26 = smov %s1749_s13  ;;  %24 = sbr.rel (!%p22_p6) target bundleno = 9 (0x9), region = 102 }
 0x3e5   :  { %1021 = vsyncpa [#allocation5], 1 }
 0x3e6   :  { %1023 = vsyncpa [#allocation5 + $0x1], 1 }
 0x3e7   :  { %1024 = vsyncpa [#allocation9], 1 }
 0x3e8   :  { %1025 = vsyncpa [#allocation6], 1 }
 0x3e9   :  { %1027 = vsyncpa [#allocation6 + $0x1], 1 }
 0x3ea   :  { %1028 = vsyncpa [#allocation7], 1 }
 0x3eb   :  { %1030 = vsyncpa [#allocation7 + $0x1], 1 }

</bundles_post_ra>
